<compile_context>
chip_gen: v5e
topology: v5e:2x2
jax: 0.10.0
libtpu: 0.0.40
codegen_flags: <defaults>
</compile_context>

<pallas_src>
import functools

import jax
import jax.numpy as jnp
from jax.experimental import pallas as pl
from jax.experimental.pallas import tpu as pltpu

W_DIM = 512  # latent dim of the style vector `w` (nn.Linear(512, in_ch))


def _modconv_kernel(style_ref, d_ref, w_ref, x_ref, out_ref, xs_ref,
                    *, K, Wp, Lout):
    """One grid step == one batch element.

    style_ref : (1, C, 1)    f32   per-in-channel modulation (affine(w) + 1)
    d_ref     : (1, OC, 1)   f32   per-out-channel demodulation scale
    w_ref     : (K*K, OC, C) bf16  raw conv weight, tap-major (grid constant)
    x_ref     : (1, C, Nf)   f32   zero-padded, spatially flattened activations
    out_ref   : (1, OC, Lout) f32  flat output on the padded-width grid
    xs_ref    : (C, Nf)      bf16  VMEM scratch: style-scaled activations
    """
    # Fold modulation into the activations (multiply in f32, store bf16 MXU operand).
    xs_ref[...] = (x_ref[0] * style_ref[0]).astype(xs_ref.dtype)

    OC = w_ref.shape[1]
    acc = jnp.zeros((OC, Lout), jnp.float32)
    # 3x3 conv == K*K MXU matmuls against lane-shifted windows of the flat slab.
    for t in range(K * K):
        s = (t // K) * Wp + (t % K)                # static lane offset for tap t
        patch = xs_ref[:, pl.ds(s, Lout)]          # (C, Lout) bf16
        acc = acc + jnp.dot(w_ref[t], patch,
                            preferred_element_type=jnp.float32)

    # Fold demodulation into the output; lane-dense store.
    out_ref[0] = (acc * d_ref[0]).astype(out_ref.dtype)


def modconv(x, wvec, weight, aff_w, aff_b, k=3, demod=True):
    """x: (b, c, h, w) NCHW, wvec: (b, 512), weight: (out_ch, c, k, k)."""
    b, c, h, w_ = x.shape
    oc = weight.shape[0]
    pad = k // 2
    hp, wp = h + 2 * pad, w_ + 2 * pad
    lout = h * wp                 # flat output length on the padded-width grid
    nf = (hp + 1) * wp            # +1 extra zero row: slide room for the taps

    # --- hoisted per-batch scalars: style = affine(w)+1 and demod scale d ----
    style = (wvec @ aff_w.T + aff_b + 1.0).astype(jnp.float32)        # (b, c)
    if demod:
        wsq = jnp.sum(weight.astype(jnp.float32) ** 2, axis=(2, 3))   # (oc, c)
        d = jax.lax.rsqrt(
            jnp.einsum("bc,oc->bo", style * style, wsq,
                       precision=jax.lax.Precision.HIGHEST) + 1e-8)   # (b, oc)
    else:
        d = jnp.ones((b, oc), jnp.float32)
    style3 = style.reshape(b, c, 1)
    d3 = d.astype(jnp.float32).reshape(b, oc, 1)

    # --- padded + spatially flattened activations (reshape of the pad is free)
    # TODO(synk): at large resolutions this jnp.pad is one extra HBM pass; it
    # could be fused by DMA-ing the unpadded block into a zero-initialized
    # VMEM scratch with a border inside the kernel.
    xpad = jnp.pad(x, ((0, 0), (0, 0), (pad, pad + 1), (pad, pad)))
    xflat = xpad.reshape(b, c, nf)

    # Raw weight, tap-major, bf16 MXU operand (constant across the grid).
    w3 = jnp.transpose(weight, (2, 3, 0, 1)).reshape(k * k, oc, c)
    w3 = w3.astype(jnp.bfloat16)

    kernel = functools.partial(_modconv_kernel, K=k, Wp=wp, Lout=lout)

    out_flat = pl.pallas_call(
        kernel,
        out_shape=jax.ShapeDtypeStruct((b, oc, lout), jnp.float32),
        grid_spec=pltpu.PrefetchScalarGridSpec(
            num_scalar_prefetch=0,
            grid=(b,),
            in_specs=[
                pl.BlockSpec((1, c, 1), lambda i: (i, 0, 0)),        # style
                pl.BlockSpec((1, oc, 1), lambda i: (i, 0, 0)),       # demod d
                pl.BlockSpec((k * k, oc, c), lambda i: (0, 0, 0)),   # weight
                pl.BlockSpec((1, c, nf), lambda i: (i, 0, 0)),       # x (flat)
            ],
            out_specs=pl.BlockSpec((1, oc, lout), lambda i: (i, 0, 0)),
            scratch_shapes=[pltpu.VMEM((c, nf), jnp.bfloat16)],
        ),
        compiler_params=pltpu.CompilerParams(
            dimension_semantics=("parallel",)),   # batch images independent
    )(style3, d3, w3, xflat)

    # (b, oc, h*wp) -> (b, oc, h, wp) -> trim the pad columns once.
    return out_flat.reshape(b, oc, h, wp)[:, :, :, :w_]


# ---------------------------------------------------------------------------
# Pure-JAX reference (mirrors the PyTorch forward) for a correctness check.
# ---------------------------------------------------------------------------
def modconv_ref(x, wvec, weight, aff_w, aff_b, k=3, demod=True):
    b, c, h, w_ = x.shape
    style = (wvec @ aff_w.T + aff_b).reshape(b, 1, c, 1, 1) + 1.0
    wgt = weight[None] * style                                   # (b, oc, c, k, k)
    if demod:
        d = jax.lax.rsqrt(jnp.sum(wgt ** 2, axis=(2, 3, 4)) + 1e-8)
        wgt = wgt * d[:, :, None, None, None]
    outs = []
    for i in range(b):
        o = jax.lax.conv_general_dilated(
            x[i:i + 1], wgt[i], window_strides=(1, 1), padding="SAME",
            dimension_numbers=("NCHW", "OIHW", "NCHW"))
        outs.append(o)
    return jnp.concatenate(outs, axis=0)


if __name__ == "__main__":
    key = jax.random.PRNGKey(0)
    kx, kw, kwt, kaw, kab = jax.random.split(key, 5)

    b, in_ch, out_ch, k, h = 2, 4, 8, 3, 16

    x = jax.random.normal(kx, (b, in_ch, h, h), jnp.float32)
    wvec = jax.random.normal(kw, (b, W_DIM), jnp.float32)
    # Deterministic synthetic parameters (shapes from ModConv.__init__):
    weight = jax.random.normal(kwt, (out_ch, in_ch, k, k), jnp.float32)
    aff_w = jax.random.normal(kaw, (in_ch, W_DIM), jnp.float32) * 0.02
    aff_b = jax.random.normal(kab, (in_ch,), jnp.float32) * 0.02

    out = modconv(x, wvec, weight, aff_w, aff_b, k=k, demod=True)
    out = jax.block_until_ready(out)

    ref = modconv_ref(x, wvec, weight, aff_w, aff_b, k=k, demod=True)
    assert out.shape == (b, out_ch, h, h)
    err = float(jnp.max(jnp.abs(out - ref)))
    # bf16 MXU operands with f32 accumulation -> allow a few e-3 of error.
    assert err < 3e-2, err

    print("KERNEL_OK")
</pallas_src>

<mosaic_0001>
module attributes {stable_mosaic.version = 11 : i64} {
  func.func @_modconv_kernel(%arg0: i32, %arg1: memref<1x4x1xf32, #tpu.memory_space<vmem>>, %arg2: memref<1x8x1xf32, #tpu.memory_space<vmem>>, %arg3: memref<9x8x4xbf16, #tpu.memory_space<vmem>>, %arg4: memref<1x4x342xf32, #tpu.memory_space<vmem>>, %arg5: memref<1x8x288xf32, #tpu.memory_space<vmem>>, %arg6: memref<4x342xbf16, #tpu.memory_space<vmem>>) attributes {dimension_semantics = [#tpu.dimension_semantics<parallel>], iteration_bounds = array<i64: 2>, scalar_prefetch = 0 : i64, scratch_operands = 1 : i64, tpu.core_type = #tpu.core_type<tc>, window_params = [{transform_indices = @transform_0, window_bounds = array<i64: 1, 4, 1>}, {transform_indices = @transform_1, window_bounds = array<i64: 1, 8, 1>}, {pipeline_mode = #tpu.pipeline_mode<synchronous>, transform_indices = @transform_2, window_bounds = array<i64: 9, 8, 4>}, {transform_indices = @transform_3, window_bounds = array<i64: 1, 4, 342>}, {transform_indices = @transform_4, window_bounds = array<i64: 1, 8, 288>}]} {
    %c0 = arith.constant 0 : index
    %c0_0 = arith.constant 0 : index
    %c0_1 = arith.constant 0 : index
    %0 = vector.load %arg4[%c0, %c0_0, %c0_1] : memref<1x4x342xf32, #tpu.memory_space<vmem>>, vector<1x4x342xf32>
    %1 = vector.shape_cast %0 : vector<1x4x342xf32> to vector<4x342xf32>
    %c0_2 = arith.constant 0 : index
    %c0_3 = arith.constant 0 : index
    %c0_4 = arith.constant 0 : index
    %2 = vector.load %arg1[%c0_2, %c0_3, %c0_4] : memref<1x4x1xf32, #tpu.memory_space<vmem>>, vector<1x4x1xf32>
    %3 = vector.shape_cast %2 : vector<1x4x1xf32> to vector<4x1xf32>
    %4 = vector.broadcast %3 : vector<4x1xf32> to vector<4x342xf32>
    %5 = arith.mulf %1, %4 : vector<4x342xf32>
    %6 = arith.truncf %5 : vector<4x342xf32> to vector<4x342xbf16>
    %c0_5 = arith.constant 0 : index
    %c0_6 = arith.constant 0 : index
    %7 = vector.load %arg6[%c0_5, %c0_6] : memref<4x342xbf16, #tpu.memory_space<vmem>>, vector<4x342xbf16>
    tpu.vector_store %arg6[%c0_5, %c0_6], %6 {strides = array<i32>} : memref<4x342xbf16, #tpu.memory_space<vmem>>, vector<4x342xbf16>,
    %cst = arith.constant 0.000000e+00 : f32
    %8 = vector.broadcast %cst : f32 to vector<8x288xf32>
    %c0_7 = arith.constant 0 : index
    %c0_8 = arith.constant 0 : index
    %9 = vector.load %arg6[%c0_7, %c0_8] : memref<4x342xbf16, #tpu.memory_space<vmem>>, vector<4x288xbf16>
    %c0_9 = arith.constant 0 : index
    %c0_10 = arith.constant 0 : index
    %c0_11 = arith.constant 0 : index
    %10 = vector.load %arg3[%c0_9, %c0_10, %c0_11] : memref<9x8x4xbf16, #tpu.memory_space<vmem>>, vector<1x8x4xbf16>
    %11 = vector.shape_cast %10 : vector<1x8x4xbf16> to vector<8x4xbf16>
    %cst_12 = arith.constant dense<0.000000e+00> : vector<8x288xf32>
    %12 = tpu.matmul %11, %9, %cst_12 {dimension_numbers = #tpu.dot_dimension_numbers<[1], [0], [0], [1], [0, 0, 1, 1], [], []>} : vector<8x4xbf16>, vector<4x288xbf16>, vector<8x288xf32> -> vector<8x288xf32>
    %13 = arith.addf %8, %12 : vector<8x288xf32>
    %c0_13 = arith.constant 0 : index
    %c1 = arith.constant 1 : index
    %14 = vector.load %arg6[%c0_13, %c1] : memref<4x342xbf16, #tpu.memory_space<vmem>>, vector<4x288xbf16>
    %c1_14 = arith.constant 1 : index
    %c0_15 = arith.constant 0 : index
    %c0_16 = arith.constant 0 : index
    %15 = vector.load %arg3[%c1_14, %c0_15, %c0_16] : memref<9x8x4xbf16, #tpu.memory_space<vmem>>, vector<1x8x4xbf16>
    %16 = vector.shape_cast %15 : vector<1x8x4xbf16> to vector<8x4xbf16>
    %cst_17 = arith.constant dense<0.000000e+00> : vector<8x288xf32>
    %17 = tpu.matmul %16, %14, %cst_17 {dimension_numbers = #tpu.dot_dimension_numbers<[1], [0], [0], [1], [0, 0, 1, 1], [], []>} : vector<8x4xbf16>, vector<4x288xbf16>, vector<8x288xf32> -> vector<8x288xf32>
    %18 = arith.addf %13, %17 : vector<8x288xf32>
    %c0_18 = arith.constant 0 : index
    %c2 = arith.constant 2 : index
    %19 = vector.load %arg6[%c0_18, %c2] : memref<4x342xbf16, #tpu.memory_space<vmem>>, vector<4x288xbf16>
    %c2_19 = arith.constant 2 : index
    %c0_20 = arith.constant 0 : index
    %c0_21 = arith.constant 0 : index
    %20 = vector.load %arg3[%c2_19, %c0_20, %c0_21] : memref<9x8x4xbf16, #tpu.memory_space<vmem>>, vector<1x8x4xbf16>
    %21 = vector.shape_cast %20 : vector<1x8x4xbf16> to vector<8x4xbf16>
    %cst_22 = arith.constant dense<0.000000e+00> : vector<8x288xf32>
    %22 = tpu.matmul %21, %19, %cst_22 {dimension_numbers = #tpu.dot_dimension_numbers<[1], [0], [0], [1], [0, 0, 1, 1], [], []>} : vector<8x4xbf16>, vector<4x288xbf16>, vector<8x288xf32> -> vector<8x288xf32>
    %23 = arith.addf %18, %22 : vector<8x288xf32>
    %c0_23 = arith.constant 0 : index
    %c18 = arith.constant 18 : index
    %24 = vector.load %arg6[%c0_23, %c18] : memref<4x342xbf16, #tpu.memory_space<vmem>>, vector<4x288xbf16>
    %c3 = arith.constant 3 : index
    %c0_24 = arith.constant 0 : index
    %c0_25 = arith.constant 0 : index
    %25 = vector.load %arg3[%c3, %c0_24, %c0_25] : memref<9x8x4xbf16, #tpu.memory_space<vmem>>, vector<1x8x4xbf16>
    %26 = vector.shape_cast %25 : vector<1x8x4xbf16> to vector<8x4xbf16>
    %cst_26 = arith.constant dense<0.000000e+00> : vector<8x288xf32>
    %27 = tpu.matmul %26, %24, %cst_26 {dimension_numbers = #tpu.dot_dimension_numbers<[1], [0], [0], [1], [0, 0, 1, 1], [], []>} : vector<8x4xbf16>, vector<4x288xbf16>, vector<8x288xf32> -> vector<8x288xf32>
    %28 = arith.addf %23, %27 : vector<8x288xf32>
    %c0_27 = arith.constant 0 : index
    %c19 = arith.constant 19 : index
    %29 = vector.load %arg6[%c0_27, %c19] : memref<4x342xbf16, #tpu.memory_space<vmem>>, vector<4x288xbf16>
    %c4 = arith.constant 4 : index
    %c0_28 = arith.constant 0 : index
    %c0_29 = arith.constant 0 : index
    %30 = vector.load %arg3[%c4, %c0_28, %c0_29] : memref<9x8x4xbf16, #tpu.memory_space<vmem>>, vector<1x8x4xbf16>
    %31 = vector.shape_cast %30 : vector<1x8x4xbf16> to vector<8x4xbf16>
    %cst_30 = arith.constant dense<0.000000e+00> : vector<8x288xf32>
    %32 = tpu.matmul %31, %29, %cst_30 {dimension_numbers = #tpu.dot_dimension_numbers<[1], [0], [0], [1], [0, 0, 1, 1], [], []>} : vector<8x4xbf16>, vector<4x288xbf16>, vector<8x288xf32> -> vector<8x288xf32>
    %33 = arith.addf %28, %32 : vector<8x288xf32>
    %c0_31 = arith.constant 0 : index
    %c20 = arith.constant 20 : index
    %34 = vector.load %arg6[%c0_31, %c20] : memref<4x342xbf16, #tpu.memory_space<vmem>>, vector<4x288xbf16>
    %c5 = arith.constant 5 : index
    %c0_32 = arith.constant 0 : index
    %c0_33 = arith.constant 0 : index
    %35 = vector.load %arg3[%c5, %c0_32, %c0_33] : memref<9x8x4xbf16, #tpu.memory_space<vmem>>, vector<1x8x4xbf16>
    %36 = vector.shape_cast %35 : vector<1x8x4xbf16> to vector<8x4xbf16>
    %cst_34 = arith.constant dense<0.000000e+00> : vector<8x288xf32>
    %37 = tpu.matmul %36, %34, %cst_34 {dimension_numbers = #tpu.dot_dimension_numbers<[1], [0], [0], [1], [0, 0, 1, 1], [], []>} : vector<8x4xbf16>, vector<4x288xbf16>, vector<8x288xf32> -> vector<8x288xf32>
    %38 = arith.addf %33, %37 : vector<8x288xf32>
    %c0_35 = arith.constant 0 : index
    %c36 = arith.constant 36 : index
    %39 = vector.load %arg6[%c0_35, %c36] : memref<4x342xbf16, #tpu.memory_space<vmem>>, vector<4x288xbf16>
    %c6 = arith.constant 6 : index
    %c0_36 = arith.constant 0 : index
    %c0_37 = arith.constant 0 : index
    %40 = vector.load %arg3[%c6, %c0_36, %c0_37] : memref<9x8x4xbf16, #tpu.memory_space<vmem>>, vector<1x8x4xbf16>
    %41 = vector.shape_cast %40 : vector<1x8x4xbf16> to vector<8x4xbf16>
    %cst_38 = arith.constant dense<0.000000e+00> : vector<8x288xf32>
    %42 = tpu.matmul %41, %39, %cst_38 {dimension_numbers = #tpu.dot_dimension_numbers<[1], [0], [0], [1], [0, 0, 1, 1], [], []>} : vector<8x4xbf16>, vector<4x288xbf16>, vector<8x288xf32> -> vector<8x288xf32>
    %43 = arith.addf %38, %42 : vector<8x288xf32>
    %c0_39 = arith.constant 0 : index
    %c37 = arith.constant 37 : index
    %44 = vector.load %arg6[%c0_39, %c37] : memref<4x342xbf16, #tpu.memory_space<vmem>>, vector<4x288xbf16>
    %c7 = arith.constant 7 : index
    %c0_40 = arith.constant 0 : index
    %c0_41 = arith.constant 0 : index
    %45 = vector.load %arg3[%c7, %c0_40, %c0_41] : memref<9x8x4xbf16, #tpu.memory_space<vmem>>, vector<1x8x4xbf16>
    %46 = vector.shape_cast %45 : vector<1x8x4xbf16> to vector<8x4xbf16>
    %cst_42 = arith.constant dense<0.000000e+00> : vector<8x288xf32>
    %47 = tpu.matmul %46, %44, %cst_42 {dimension_numbers = #tpu.dot_dimension_numbers<[1], [0], [0], [1], [0, 0, 1, 1], [], []>} : vector<8x4xbf16>, vector<4x288xbf16>, vector<8x288xf32> -> vector<8x288xf32>
    %48 = arith.addf %43, %47 : vector<8x288xf32>
    %c0_43 = arith.constant 0 : index
    %c38 = arith.constant 38 : index
    %49 = vector.load %arg6[%c0_43, %c38] : memref<4x342xbf16, #tpu.memory_space<vmem>>, vector<4x288xbf16>
    %c8 = arith.constant 8 : index
    %c0_44 = arith.constant 0 : index
    %c0_45 = arith.constant 0 : index
    %50 = vector.load %arg3[%c8, %c0_44, %c0_45] : memref<9x8x4xbf16, #tpu.memory_space<vmem>>, vector<1x8x4xbf16>
    %51 = vector.shape_cast %50 : vector<1x8x4xbf16> to vector<8x4xbf16>
    %cst_46 = arith.constant dense<0.000000e+00> : vector<8x288xf32>
    %52 = tpu.matmul %51, %49, %cst_46 {dimension_numbers = #tpu.dot_dimension_numbers<[1], [0], [0], [1], [0, 0, 1, 1], [], []>} : vector<8x4xbf16>, vector<4x288xbf16>, vector<8x288xf32> -> vector<8x288xf32>
    %53 = arith.addf %48, %52 : vector<8x288xf32>
    %c0_47 = arith.constant 0 : index
    %c0_48 = arith.constant 0 : index
    %c0_49 = arith.constant 0 : index
    %54 = vector.load %arg2[%c0_47, %c0_48, %c0_49] : memref<1x8x1xf32, #tpu.memory_space<vmem>>, vector<1x8x1xf32>
    %55 = vector.shape_cast %54 : vector<1x8x1xf32> to vector<8x1xf32>
    %56 = vector.broadcast %55 : vector<8x1xf32> to vector<8x288xf32>
    %57 = arith.mulf %53, %56 : vector<8x288xf32>
    %c0_50 = arith.constant 0 : index
    %c0_51 = arith.constant 0 : index
    %c0_52 = arith.constant 0 : index
    %58 = vector.load %arg5[%c0_50, %c0_51, %c0_52] : memref<1x8x288xf32, #tpu.memory_space<vmem>>, vector<1x8x288xf32>
    %59 = vector.shape_cast %58 : vector<1x8x288xf32> to vector<8x288xf32>
    %60 = vector.shape_cast %57 : vector<8x288xf32> to vector<1x8x288xf32>
    tpu.vector_store %arg5[%c0_50, %c0_51, %c0_52], %60 {strides = array<i32>} : memref<1x8x288xf32, #tpu.memory_space<vmem>>, vector<1x8x288xf32>,
    return
  }
  func.func @transform_0(%arg0: i32) -> (i32, i32, i32) {
    %c0_i32 = arith.constant 0 : i32
    %c0_i32_0 = arith.constant 0 : i32
    %c0_i32_1 = arith.constant 0 : i32
    return %arg0, %c0_i32, %c0_i32_0 : i32, i32, i32
  }
  func.func @transform_1(%arg0: i32) -> (i32, i32, i32) {
    %c0_i32 = arith.constant 0 : i32
    %c0_i32_0 = arith.constant 0 : i32
    %c0_i32_1 = arith.constant 0 : i32
    return %arg0, %c0_i32, %c0_i32_0 : i32, i32, i32
  }
  func.func @transform_2(%arg0: i32) -> (i32, i32, i32) {
    %c0_i32 = arith.constant 0 : i32
    %c0_i32_0 = arith.constant 0 : i32
    %c0_i32_1 = arith.constant 0 : i32
    %c0_i32_2 = arith.constant 0 : i32
    return %c0_i32, %c0_i32_0, %c0_i32_1 : i32, i32, i32
  }
  func.func @transform_3(%arg0: i32) -> (i32, i32, i32) {
    %c0_i32 = arith.constant 0 : i32
    %c0_i32_0 = arith.constant 0 : i32
    %c0_i32_1 = arith.constant 0 : i32
    return %arg0, %c0_i32, %c0_i32_0 : i32, i32, i32
  }
  func.func @transform_4(%arg0: i32) -> (i32, i32, i32) {
    %c0_i32 = arith.constant 0 : i32
    %c0_i32_0 = arith.constant 0 : i32
    %c0_i32_1 = arith.constant 0 : i32
    return %arg0, %c0_i32, %c0_i32_0 : i32, i32, i32
  }
}

</mosaic_0001>

<bundles_post_ra>
// kernel: tpu_custom_call.1
= control target key start
LH: loop header
LB: loop body
LE: loop exit
PB: predicated region body
PF: predicated region fallthrough
CT: control target
= control target key end

     0   :  { %9 = vsyncpa [#allocation4], 0  ;;  %s1426_s0 = inlined_call_operand.vmem [shape: f32[2,4,1], index: 0, kind: input, shape index: {}]   ;;  %s1427_s1 = inlined_call_operand.vmem [shape: f32[2,8,1], index: 1, kind: input, shape index: {}]   ;;  %s1428_s2 = inlined_call_operand.vmem [shape: bf16[9,8,4], index: 2, kind: input, shape index: {}]   ;;  %s1429_s3 = inlined_call_operand.vmem [shape: f32[2,4,342], index: 3, kind: input, shape index: {}]   ;;  %s1430_s4 = inlined_call_operand.hbm [shape: f32[2,8,288], index: 4, kind: output, shape index: {}]  }
   0x1   :  { %11 = vsyncpa [#allocation4 + $0x1], 0  ;;  %s1233_s15 = smov 0   ;;  %s1235_s16 = smov 0  }
   0x2   :  { %s1237_s17 = smov 0   ;;  %s1239_s18 = smov 0  }
   0x3 LB: > { %s1254_s19 = sadd.s32 4294967295, %s1196_s18   ;;  %s1035_s20 = sadd.s32 4294967294, %s1196_s18   ;;  %s1196_s18 = sphi %s1239_s18, %s1436_s18   ;;  %s1192_s17 = sphi %s1237_s17, %s1435_s17   ;;  %s1188_s16 = sphi %s1235_s16, %s1434_s16   ;;  %s1184_s15 = sphi %s1233_s15, %s1433_s15  }
   0x4   : > { %s1258_s21 = sadd.s32 1, %s1196_s18   ;;  %s123_s22 = sadd.s32 1, %s1192_s17 }
   0x5   : > { %s120_s23 = ssub.s32 %s1196_s18, %s1258_s21  ;;  %p133_p0 = scmp.ne.s32.totalorder %s1192_s17, %s1188_s16 }
   0x6   : > { %p121_p1 = scmp.eq.s32.totalorder %s120_s23, 0  ;;  %p134_p2 = scmp.eq.s32.totalorder %s1254_s19, 1 }
   0x7   : > { %p139_p3 = scmp.ne.s32.totalorder %s1188_s16, %s1184_s15  ;;  %p140_p4 = scmp.eq.s32.totalorder %s1035_s20, 1 }
   0x8   : > { %s1269_s24 = scalar_select %p121_p1, %s1192_s17, %s123_s22  }
   0x9   : > { %p1271_p5 = por %p134_p2, %p133_p0  ;;  %p1275_p6 = por %p140_p4, %p139_p3 }
   0xa   : > { %p1038_p7 = scmp.ge.s32.totalorder %s1196_s18, 1  ;;  %p183_p8 = scmp.lt.s32.totalorder %s1196_s18, 3 }
   0xc   : > { %p184_p9 = pnand %p1038_p7, %p183_p8 }
   0xd   : > { %p217_p10 = scmp.lt.s32.totalorder (!%p184_p9), %s1254_s19, 1  ;;  %s1200_s10 = smov (!%p184_p9), 127  }
   0xe   : > { %187 = sbr.rel (%p184_p9) target bundleno = 533 (0x215), region = 36  ;;  %s1201_s11 = smov (!%p184_p9), 126  }
   0xf   : > { %s1202_s12 = smov (!%p184_p9), 110   ;;  %s1203_s13 = smov (!%p184_p9), 109  }
  0x10   : > { %s1204_s14 = smov (!%p184_p9), 108   ;;  %s1205_s20 = smov (!%p184_p9), 92  }
  0x11   : > { %s1206_s22 = smov (!%p184_p9), 91   ;;  %s1207_s23 = smov (!%p184_p9), 90  }
  0x12   : > { %s214_s7 = sand.u32 (!%p184_p9), 1, %s1188_s16   ;;  %s1082_s8 = smul.u32 (!%p184_p9), 24, %s1254_s19 }
  0x13   : > { %v1198_v0 = vmov 0   ;;  %s1283_s27 = scalar_select %p217_p10, %s1254_s19, 1  ;;  %v1199_v2 = vmov 839922192   ;;  %vm263_vm0 = vcmask 1041408   ;;  %vm274_vm1 = vcmask 1043458  }
  0x14   : > { %1132 = vset.pattern.permute.xlu0 %v1198_v0  ;;  %1133 = vset.pattern.permute.xlu1 %v1198_v0  ;;  %v239_v3 = vunpack.c.l.s4 %v1199_v2  ;;  %vm275_vm2 = vmor %vm274_vm1, %vm263_vm0  ;;  %vm276_vm3 = vcmask 701444   ;;  %vm267_vm4 = vcmask 1045508   ;;  %vm271_vm5 = vcmask 1043456   ;;  %v280_v58 = vld [vmem:[%s1428_s2] sm:$0xf] }
  0x15   : > { %s1039_s28 = sshll.u32 %s1283_s27, 2  ;;  %s1081_s6 = smul.u32 12, %s1283_s27  ;;  %vm277_vm6 = vmor %vm276_vm3, %vm275_vm2  ;;  %vm300_vm7 = vcmask 31744   ;;  %vm421_vm8 = vcmask 1031168   ;;  %vm297_vm9 = vcmask 1039360   ;;  %vm495_vm10 = vcmask 900096  }
  0x16   : > { %s220_s5 = scalar_lea.vmem %s1426_s0, %s1039_s28  ;;  %v240_v4 = vunpack.c.0.s8 %v239_v3  ;;  %vm569_vm11 = vcmask 891904   ;;  %vm643_vm12 = vcmask 883712   ;;  %vm717_vm13 = vcmask 752640  }
  0x17   : > { %v233_v1 = vld [vmem:[%s220_s5] sm:$0xf]  ;;  %s229_s9 = scalar_lea.vmem %s1429_s3, %s1081_s6  ;;  %vm791_vm14 = vcmask 744448   ;;  %vm865_vm15 = vcmask 736256  }
  0x18   : > { %236 = vperm.xlu0 %1132, %v233_v1   ;;  %v231_v5 = vld [vmem:[%s229_s9] sm:$0xff]  ;;  %v232_v6 = vld [vmem:[%s229_s9 + $0x8] sm:$0xf]  ;;  %s1080_s9 = smul.u32 24, %s214_s7 }
  0x19   : > { %v1042_v1 = vld [vmem:[%s1428_s2 + $0x4] sm:$0xf] }
  0x1a   : > { %s216_s19 = scalar_lea.vmem [#allocation3], %s1080_s9 }
  0x8a   : > { %v237_v7 = vpop.permute.xlu0 %236 }
  0x8b   : > { %v241_v8 = vperm.slane %v237_v7, %v240_v4 }
  0x8d   : > { %v243_v9 = vmul.f32 %v241_v8, %v231_v5  ;;  %v244_v10 = vmul.f32 %v241_v8, %v232_v6 }
  0x8f   : > { %247 = vst [vmem:[#allocation1] ss:$2 sm:$0xff] %v243_v9 }
  0x90   : > { %249 = vst [vmem:[#allocation1 + $0x10] ss:$2 sm:$0xff] %v244_v10 }
  0x96   : > { %v250_v11 = vld.sshfl [vmem:[#allocation1] sm:$0xff pattern:$0x75316420]  ;;  %v251_v12 = vld.sshfl [vmem:[#allocation1 + $0x8] sm:$0xff pattern:$0x75316420] }
  0x97   : > { %v252_v13 = vld.sshfl [vmem:[#allocation1 + $0x10] sm:$0xff pattern:$0x75316420]  ;;  %v256_v14 = vpack.c.bf16 %v251_v12, %v250_v11 }
  0x98   : > { %v257_v15 = vpack.c.bf16 %v252_v13, %v252_v13 }
  0x99   : > { %v260_v16 = vrot.slane %v256_v14, 2 }
  0x9a   : > { %v261_v17 = vrot.slane %v257_v15, 4  ;;  %v262_v18 = vrot.slane %v257_v15, 6 }
  0x9b   : > { %v266_v19 = vsel %vm263_vm0, %v256_v14, %v260_v16  ;;  %v1049_v14 = vld [vmem:[%s1428_s2 + $0x8] sm:$0xf] }
  0x9c   : > { %v270_v20 = vsel %vm267_vm4, %v261_v17, %v262_v18 }
  0x9d   : > { %v272_v21 = vsel %vm271_vm5, %v266_v19, %v270_v20 }
  0x9e   : > { %278 = vst.msk [vmem:[#allocation2] sm:$0x3f] %vm277_vm6, %v272_v21 }
  0xa5   : > { %v279_v22 = vld [vmem:[#allocation2] sm:$0x3f] }
  0xa6   : > { %284 = vst [vmem:[#allocation1] ss:$4 sm:$0xff] %v279_v22  ;;  %v404_v29 = vld [vmem:[#allocation2] sm:$0x3f] }
  0xa7   : > { %v478_v34 = vld [vmem:[#allocation2] sm:$0x3f] }
  0xa8   : > { %v552_v37 = vld [vmem:[#allocation2] sm:$0x3f] }
  0xa9   : > { %v626_v41 = vld [vmem:[#allocation2] sm:$0x3f] }
  0xaa   : > { %v700_v45 = vld [vmem:[#allocation2] sm:$0x3f] }
  0xab   : > { %v774_v49 = vld [vmem:[#allocation2] sm:$0x3f] }
  0xac   : > { %v848_v53 = vld [vmem:[#allocation2] sm:$0x3f] }
  0xad   : > { %v289_v23 = vld.sshfl [vmem:[#allocation1 + $0x10] sm:$0xff pattern:$0x73625140]  ;;  %v285_v24 = vld.sshfl [vmem:[#allocation1] sm:$0xff pattern:$0x73625140] }
  0xae   : > { %295 = vrot.lane.b32.xlu0 %v289_v23, %s1200_s10  ;;  %291 = vrot.lane.b32.xlu1 %v285_v24, %s1200_s10  ;;  %v287_v25 = vld.sshfl [vmem:[#allocation1 + $0x8] sm:$0xff pattern:$0x73625140] }
  0xaf   : > { %352 = vst [vmem:[#allocation1] ss:$4 sm:$0xff] %v279_v22 }
  0xb6   : > { %293 = vrot.lane.b32.xlu1 %v287_v25, %s1200_s10  ;;  %v1295_v26 = vld.sshfl [vmem:[#allocation1 + $0x8] sm:$0xff pattern:$0x73625140]  ;;  %v1297_v27 = vld.sshfl [vmem:[#allocation1 + $0x10] sm:$0xff pattern:$0x73625140] }
  0xb7   : > { %v353_v28 = vld.sshfl [vmem:[#allocation1] sm:$0xff pattern:$0x73625140]  ;;  %v361_v9 = vsel %vm263_vm0, %v1295_v26, 0  ;;  %v363_v10 = vsel %vm263_vm0, %v1297_v27, 0 }
  0xb8   : > { %v359_v30 = vsel %vm263_vm0, %v353_v28, 0  ;;  %408 = vst [vmem:[#allocation1] ss:$4 sm:$0xff] %v404_v29 }
  0xb9   : > { %372 = vmatpush.bf16.msra.mxu3 %v359_v30  ;;  %v1053_v30 = vld [vmem:[%s1428_s2 + $0xc] sm:$0xf] }
  0xbc   : > { %1046 = vmatmul.msk.bf16.vlgmr.msra.gmra.mxu3 %vm300_vm7, %v280_v58 }
  0xbf   : > { %v413_v31 = vld.sshfl [vmem:[#allocation1 + $0x10] sm:$0xff pattern:$0x73625140]  ;;  %v409_v32 = vld.sshfl [vmem:[#allocation1] sm:$0xff pattern:$0x73625140] }
  0xc0   : > { %419 = vrot.lane.b32.xlu0 %v413_v31, %s1201_s11  ;;  %415 = vrot.lane.b32.xlu2 %v409_v32, %s1201_s11  ;;  %v411_v33 = vld.sshfl [vmem:[#allocation1 + $0x8] sm:$0xff pattern:$0x73625140] }
  0xc1   : > { %482 = vst [vmem:[#allocation1] ss:$4 sm:$0xff] %v478_v34 }
  0xc8   : > { %417 = vrot.lane.b32.xlu2 %v411_v33, %s1201_s11  ;;  %v485_v35 = vld.sshfl [vmem:[#allocation1 + $0x8] sm:$0xff pattern:$0x73625140]  ;;  %v483_v36 = vld.sshfl [vmem:[#allocation1] sm:$0xff pattern:$0x73625140] }
  0xc9   : > { %491 = vrot.lane.b32.xlu1 %v485_v35, %s1202_s12  ;;  %489 = vrot.lane.b32.xlu0 %v483_v36, %s1202_s12  ;;  %v487_v38 = vld.sshfl [vmem:[#allocation1 + $0x10] sm:$0xff pattern:$0x73625140] }
  0xca   : > { %556 = vst [vmem:[#allocation1] ss:$4 sm:$0xff] %v552_v37 }
  0xd0   : > { %493 = vrot.lane.b32.xlu2 %v487_v38, %s1202_s12  ;;  %s947_s12 = scalar_lea.hbm %s1430_s4, %s1082_s8 }
  0xd1   : > { %v561_v39 = vld.sshfl [vmem:[#allocation1 + $0x10] sm:$0xff pattern:$0x73625140]  ;;  %v559_v40 = vld.sshfl [vmem:[#allocation1 + $0x8] sm:$0xff pattern:$0x73625140] }
  0xd2   : > { %567 = vrot.lane.b32.xlu1 %v561_v39, %s1203_s13  ;;  %565 = vrot.lane.b32.xlu0 %v559_v40, %s1203_s13  ;;  %v557_v42 = vld.sshfl [vmem:[#allocation1] sm:$0xff pattern:$0x73625140]  ;;  %v1057_v40 = vld [vmem:[%s1428_s2 + $0x10] sm:$0xf] }
  0xd3   : > { %630 = vst [vmem:[#allocation1] ss:$4 sm:$0xff] %v626_v41  ;;  %v1061_v41 = vld [vmem:[%s1428_s2 + $0x14] sm:$0xf] }
  0xd8   : > { %563 = vrot.lane.b32.xlu2 %v557_v42, %s1203_s13  ;;  %s949_s13 = sshll.u32 %s216_s19, 4  ;;  %s950_s13 = int_to_ptr.vmem [resolvable:$true] %s949_s13 }
  0xda   : > { %v635_v43 = vld.sshfl [vmem:[#allocation1 + $0x10] sm:$0xff pattern:$0x73625140]  ;;  %v631_v44 = vld.sshfl [vmem:[#allocation1] sm:$0xff pattern:$0x73625140] }
  0xdb   : > { %637 = vrot.lane.b32.xlu1 %v631_v44, %s1204_s14  ;;  %v633_v46 = vld.sshfl [vmem:[#allocation1 + $0x8] sm:$0xff pattern:$0x73625140] }
  0xdc   : > { %704 = vst [vmem:[#allocation1] ss:$4 sm:$0xff] %v700_v45 }
  0xe0   : > { %639 = vrot.lane.b32.xlu2 %v633_v46, %s1204_s14 }
  0xe3   : > { %v707_v47 = vld.sshfl [vmem:[#allocation1 + $0x8] sm:$0xff pattern:$0x73625140]  ;;  %v705_v48 = vld.sshfl [vmem:[#allocation1] sm:$0xff pattern:$0x73625140] }
  0xe4   : > { %713 = vrot.lane.b32.xlu1 %v707_v47, %s1205_s20  ;;  %711 = vrot.lane.b32.xlu0 %v705_v48, %s1205_s20  ;;  %v709_v50 = vld.sshfl [vmem:[#allocation1 + $0x10] sm:$0xff pattern:$0x73625140] }
  0xe5   : > { %778 = vst [vmem:[#allocation1] ss:$4 sm:$0xff] %v774_v49 }
  0xe8   : > { %641 = vrot.lane.b32.xlu2 %v635_v43, %s1204_s14  ;;  %s951_s14 = sshll.u32 %s947_s12, 4  ;;  %s952_s14 = int_to_ptr.hbm [resolvable:$true] %s951_s14 }
  0xec   : > { %715 = vrot.lane.b32.xlu0 %v709_v50, %s1205_s20  ;;  %v781_v51 = vld.sshfl [vmem:[#allocation1 + $0x8] sm:$0xff pattern:$0x73625140]  ;;  %v783_v52 = vld.sshfl [vmem:[#allocation1 + $0x10] sm:$0xff pattern:$0x73625140] }
  0xed   : > { %787 = vrot.lane.b32.xlu1 %v781_v51, %s1206_s22  ;;  %v779_v54 = vld.sshfl [vmem:[#allocation1] sm:$0xff pattern:$0x73625140]  ;;  %s936_s20 = scalar_lea.sflag [#allocation4], %s214_s7 }
  0xee   : > { %852 = vst [vmem:[#allocation1] ss:$4 sm:$0xff] %v848_v53 }
  0xf0   : > { %789 = vrot.lane.b32.xlu2 %v783_v52, %s1206_s22 }
  0xf4   : > { %785 = vrot.lane.b32.xlu0 %v779_v54, %s1206_s22  ;;  %s1040_s22 = sshll.u32 %s1283_s27, 3  ;;  %s1154_s27 = scalar_lea.hbm %s1430_s4, 48 }
  0xf5   : > { %v857_v55 = vld.sshfl [vmem:[#allocation1 + $0x10] sm:$0xff pattern:$0x73625140]  ;;  %v853_v56 = vld.sshfl [vmem:[#allocation1] sm:$0xff pattern:$0x73625140]  ;;  %s224_s29 = scalar_lea.vmem %s1427_s1, %s1040_s22 }
  0xf6   : > { %863 = vrot.lane.b32.xlu1 %v857_v55, %s1207_s23  ;;  %v855_v57 = vld.sshfl [vmem:[#allocation1 + $0x8] sm:$0xff pattern:$0x73625140]  ;;  %v1065_v55 = vld [vmem:[%s1428_s2 + $0x18] sm:$0xf]  ;;  %s1148_s22 = sshra.s32 %s952_s14, 4  ;;  %s1149_s22 = int_to_ptr.hbm [resolvable:$true] %s1148_s22 }
  0xf7   : > { %p1155_p0 = scmp.lt.s32.totalorder %s1149_s22, %s1430_s4 }
  0xf8   : > { %859 = vrot.lane.b32.xlu2 %v853_v56, %s1207_s23 }
  0xfc   : > { %861 = vrot.lane.b32.xlu0 %v855_v57, %s1207_s23  ;;  %s1150_s23 = scalar_lea.hbm %s1149_s22, 24 }
  0xfd   : > { %p1151_p11 = scmp.ne.s32.totalorder %s1149_s22, %s1150_s23  ;;  %p1156_p1 = scmp.lt.s32.totalorder %s1154_s27, %s1150_s23 }
  0xff   : > { %p1152_p12 = pnand %p1151_p11, %p1271_p5  ;;  %p1157_p2 = por %p1156_p1, %p1155_p0 }
 0x101   : > { %p1153_p13 = pneg %p1152_p12 }
 0x103   : > { %p1158_p3 = pnand %p1157_p2, %p1153_p13 }
 0x11a   : > { %v416_v59 = vpop.permute.xlu2 %415 }
 0x120   : > { %v296_v60 = vpop.permute.xlu0 %295  ;;  %v292_v61 = vpop.permute.xlu1 %291 }
 0x121   : > { %v311_v62 = vsel %vm263_vm0, %v296_v60, 0 }
 0x122   : > { %v418_v63 = vpop.permute.xlu2 %417  ;;  %346 = vmatpush.bf16.msra.mxu2 %v311_v62 }
 0x123   : > { %v422_v0 = vsel %vm421_vm8, %v416_v59, %v418_v63 }
 0x124   : > { %v428_v2 = vsel %vm263_vm0, %v422_v0, 0 }
 0x125   : > { %1045 = vmatmul.msk.bf16.vlgmr.msra.gmra.mxu2 %vm300_vm7, %v1042_v1 }
 0x126   : > { %443 = vmatpush.bf16.msrb.mxu2 %v428_v2 }
 0x128   : > { %v294_v3 = vpop.permute.xlu1 %293 }
 0x129   : > { %v298_v4 = vsel %vm297_vm9, %v292_v61, %v294_v3  ;;  %v299_v5 = vsel %vm297_vm9, %v294_v3, %v296_v60 }
 0x12a   : > { %v305_v6 = vsel %vm263_vm0, %v298_v4, 0  ;;  %v308_v7 = vsel %vm263_vm0, %v299_v5, 0  ;;  %v494_v8 = vpop.permute.xlu2 %493  ;;  %v1069_v4 = vld [vmem:[%s1428_s2 + $0x1c] sm:$0xf]  ;;  %v1073_v5 = vld [vmem:[%s1428_s2 + $0x20] sm:$0xf] }
 0x12b   : > { %320 = vmatpush.bf16.msra.mxu0 %v305_v6  ;;  %333 = vmatpush.bf16.msra.mxu1 %v308_v7  ;;  %v508_v16 = vsel %vm263_vm0, %v494_v8, 0 }
 0x12e   : > { %1043 = vmatmul.msk.bf16.vlgmr.msra.gmra.mxu0 %vm300_vm7, %v1042_v1  ;;  %1044 = vmatmul.msk.bf16.vlgmr.msra.gmra.mxu1 %vm300_vm7, %v1042_v1  ;;  %v922_v1 = vld [vmem:[%s224_s29] sm:$0xff] }
 0x12f   : > { %385 = vmatpush.bf16.msrb.mxu0 %v361_v9  ;;  %398 = vmatpush.bf16.msrb.mxu1 %v363_v10 }
 0x130   : > { %925 = vperm.xlu1 %1133, %v922_v1  }
 0x132   : > { %v420_v11 = vpop.permute.xlu0 %419  ;;  %v564_v17 = vpop.permute.xlu2 %563 }
 0x133   : > { %v434_v12 = vsel %vm263_vm0, %v420_v11, 0  ;;  %v423_v13 = vsel %vm421_vm8, %v418_v63, %v420_v11 }
 0x134   : > { %469 = vmatpush.bf16.msra.mxu0 %v434_v12  ;;  %v431_v15 = vsel %vm263_vm0, %v423_v13, 0 }
 0x135   : > { %456 = vmatpush.bf16.msrb.mxu3 %v431_v15  ;;  %1050 = vmatmul.msk.bf16.vlgmr.msrb.gmra.mxu2 %vm300_vm7, %v1049_v14 }
 0x138   : > { %1051 = vmatmul.msk.bf16.vlgmr.msrb.gmra.mxu3 %vm300_vm7, %v1049_v14 }
 0x139   : > { %543 = vmatpush.bf16.msra.mxu3 %v508_v16 }
 0x13a   : > { %v640_v24 = vpop.permute.xlu2 %639 }
 0x13b   : > { %v492_v18 = vpop.permute.xlu1 %491  ;;  %v490_v19 = vpop.permute.xlu0 %489 }
 0x13c   : > { %v497_v20 = vsel %vm495_vm10, %v492_v18, %v494_v8  ;;  %v496_v21 = vsel %vm495_vm10, %v490_v19, %v492_v18 }
 0x13d   : > { %v505_v22 = vsel %vm263_vm0, %v497_v20, 0  ;;  %v502_v23 = vsel %vm263_vm0, %v496_v21, 0 }
 0x13e   : > { %517 = vmatpush.bf16.msra.mxu1 %v502_v23  ;;  %530 = vmatpush.bf16.msra.mxu2 %v505_v22 }
 0x13f   : > { %1047 = vmatmul.msk.bf16.vlgmr.msrb.gmra.mxu0 %vm300_vm7, %v280_v58  ;;  %1048 = vmatmul.msk.bf16.vlgmr.msrb.gmra.mxu1 %vm300_vm7, %v280_v58  ;;  %v374_v6 = vpop.f32.mrf.mxu3 }
 0x142   : > { %v642_v33 = vpop.permute.xlu2 %641 }
 0x143   : > { %v645_v34 = vsel %vm643_vm12, %v640_v24, %v642_v33  ;;  %v656_v39 = vsel %vm263_vm0, %v642_v33, 0 }
 0x144   : > { %v568_v25 = vpop.permute.xlu1 %567  ;;  %v566_v26 = vpop.permute.xlu0 %565  ;;  %v653_v37 = vsel %vm263_vm0, %v645_v34, 0 }
 0x145   : > { %v582_v27 = vsel %vm263_vm0, %v568_v25, 0  ;;  %v570_v28 = vsel %vm569_vm11, %v564_v17, %v566_v26  ;;  %v571_v29 = vsel %vm569_vm11, %v566_v26, %v568_v25  ;;  %1055 = vmatmul.msk.bf16.vlgmr.msra.gmra.mxu2 %vm300_vm7, %v1053_v30 }
 0x146   : > { %v576_v31 = vsel %vm263_vm0, %v570_v28, 0  ;;  %v579_v32 = vsel %vm263_vm0, %v571_v29, 0  ;;  %617 = vmatpush.bf16.msrb.mxu2 %v582_v27 }
 0x147   : > { %591 = vmatpush.bf16.msrb.mxu0 %v576_v31  ;;  %604 = vmatpush.bf16.msrb.mxu1 %v579_v32  ;;  %v376_v7 = vpop.f32.mrf.mxu3 }
 0x148   : > { %1056 = vmatmul.msk.bf16.vlgmr.msra.gmra.mxu3 %vm300_vm7, %v1053_v30 }
 0x14a   : > { %v790_v46 = vpop.permute.xlu2 %789 }
 0x14b   : > { %v804_v53 = vsel %vm263_vm0, %v790_v46, 0 }
 0x14d   : > { %v638_v35 = vpop.permute.xlu1 %637 }
 0x14e   : > { %v644_v36 = vsel %vm643_vm12, %v638_v35, %v640_v24 }
 0x14f   : > { %v650_v38 = vsel %vm263_vm0, %v644_v36, 0  ;;  %1052 = vmatmul.msk.bf16.vlgmr.msra.gmra.mxu0 %vm300_vm7, %v1049_v14  ;;  %1054 = vmatmul.msk.bf16.vlgmr.msra.gmra.mxu1 %vm300_vm7, %v1053_v30 }
 0x150   : > { %665 = vmatpush.bf16.msrb.mxu3 %v650_v38  ;;  %678 = vmatpush.bf16.msra.mxu0 %v653_v37 }
 0x151   : > { %691 = vmatpush.bf16.msra.mxu1 %v656_v39 }
 0x152   : > { %v860_v61 = vpop.permute.xlu2 %859 }
 0x155   : > { %1060 = vmatmul.msk.bf16.vlgmr.msrb.gmra.mxu2 %vm300_vm7, %v1057_v40 }
 0x156   : > { %v714_v42 = vpop.permute.xlu1 %713  ;;  %v712_v43 = vpop.permute.xlu0 %711 }
 0x157   : > { %v718_v44 = vsel %vm717_vm13, %v712_v43, %v714_v42 }
 0x158   : > { %v724_v45 = vsel %vm263_vm0, %v718_v44, 0  ;;  %1062 = vmatmul.msk.bf16.vlgmr.msrb.gmra.mxu3 %vm300_vm7, %v1061_v41 }
 0x159   : > { %739 = vmatpush.bf16.msra.mxu2 %v724_v45 }
 0x15e   : > { %v716_v47 = vpop.permute.xlu0 %715 }
 0x15f   : > { %v719_v48 = vsel %vm717_vm13, %v714_v42, %v716_v47  ;;  %v730_v49 = vsel %vm263_vm0, %v716_v47, 0  ;;  %v788_v50 = vpop.permute.xlu1 %787  ;;  %1058 = vmatmul.msk.bf16.vlgmr.msrb.gmra.mxu0 %vm300_vm7, %v1057_v40  ;;  %1059 = vmatmul.msk.bf16.vlgmr.msrb.gmra.mxu1 %vm300_vm7, %v1057_v40 }
 0x160   : > { %v727_v51 = vsel %vm263_vm0, %v719_v48, 0  ;;  %v793_v52 = vsel %vm791_vm14, %v788_v50, %v790_v46  ;;  %765 = vmatpush.bf16.msrb.mxu0 %v730_v49 }
 0x161   : > { %v801_v54 = vsel %vm263_vm0, %v793_v52, 0  ;;  %752 = vmatpush.bf16.msra.mxu3 %v727_v51 }
 0x162   : > { %826 = vmatpush.bf16.msrb.mxu2 %v801_v54 }
 0x165   : > { %839 = vmatpush.bf16.msrb.mxu3 %v804_v53  ;;  %1066 = vmatmul.msk.bf16.vlgmr.msra.gmra.mxu2 %vm300_vm7, %v1065_v55 }
 0x166   : > { %v786_v56 = vpop.permute.xlu0 %785 }
 0x167   : > { %v792_v57 = vsel %vm791_vm14, %v786_v56, %v788_v50 }
 0x168   : > { %v798_v58 = vsel %vm263_vm0, %v792_v57, 0  ;;  %v864_v59 = vpop.permute.xlu1 %863  ;;  %1067 = vmatmul.msk.bf16.vlgmr.msra.gmra.mxu3 %vm300_vm7, %v1065_v55 }
 0x169   : > { %v878_v60 = vsel %vm263_vm0, %v864_v59, 0  ;;  %813 = vmatpush.bf16.msrb.mxu1 %v798_v58 }
 0x16a   : > { %913 = vmatpush.bf16.msra.mxu2 %v878_v60 }
 0x16e   : > { %v862_v62 = vpop.permute.xlu0 %861 }
 0x16f   : > { %v866_v63 = vsel %vm865_vm15, %v860_v61, %v862_v62  ;;  %v867_v0 = vsel %vm865_vm15, %v862_v62, %v864_v59  ;;  %1063 = vmatmul.msk.bf16.vlgmr.msra.gmra.mxu0 %vm300_vm7, %v1061_v41  ;;  %1064 = vmatmul.msk.bf16.vlgmr.msra.gmra.mxu1 %vm300_vm7, %v1061_v41 }
 0x170   : > { %v872_v2 = vsel %vm263_vm0, %v866_v63, 0  ;;  %v875_v3 = vsel %vm263_vm0, %v867_v0, 0  ;;  %vm933_vm0 = vcmask 261120  }
 0x171   : > { %887 = vmatpush.bf16.msra.mxu0 %v872_v2  ;;  %900 = vmatpush.bf16.msra.mxu1 %v875_v3 }
 0x175   : > { %1071 = vmatmul.msk.bf16.vlgmr.msrb.gmra.mxu2 %vm300_vm7, %v1069_v4 }
 0x178   : > { %1072 = vmatmul.msk.bf16.vlgmr.msrb.gmra.mxu3 %vm300_vm7, %v1069_v4 }
 0x17f   : > { %1068 = vmatmul.msk.bf16.vlgmr.msrb.gmra.mxu0 %vm300_vm7, %v1065_v55  ;;  %1070 = vmatmul.msk.bf16.vlgmr.msrb.gmra.mxu1 %vm300_vm7, %v1069_v4 }
 0x185   : > { %1076 = vmatmul.msk.bf16.vlgmr.msra.gmra.mxu2 %vm300_vm7, %v1073_v5 }
 0x18f   : > { %1074 = vmatmul.msk.bf16.vlgmr.msra.gmra.mxu0 %vm300_vm7, %v1073_v5  ;;  %1075 = vmatmul.msk.bf16.vlgmr.msra.gmra.mxu1 %vm300_vm7, %v1073_v5 }
 0x1a8   : > { %v348_v8 = vpop.f32.mrf.mxu2 }
 0x1ab   : > { %v322_v9 = vpop.f32.mrf.mxu0  ;;  %v335_v10 = vpop.f32.mrf.mxu1 }
 0x1ac   : > { %v375_v11 = vadd.f32 %v374_v6, %v322_v9 }
 0x1b0   : > { %v350_v12 = vpop.f32.mrf.mxu2 }
 0x1b1   : > { %v926_v12 = vpop.permute.xlu1 %925 }
 0x1b3   : > { %v324_v13 = vpop.f32.mrf.mxu0  ;;  %v337_v14 = vpop.f32.mrf.mxu1 }
 0x1b8   : > { %v445_v15 = vpop.f32.mrf.mxu2 }
 0x1b9   : > { %v475_v16 = vadd.f32 %v445_v15, %v375_v11 }
 0x1bb   : > { %v458_v17 = vpop.f32.mrf.mxu3 }
 0x1bc   : > { %v387_v18 = vpop.f32.mrf.mxu0  ;;  %v400_v19 = vpop.f32.mrf.mxu1 }
 0x1bd   : > { %v388_v20 = vadd.f32 %v387_v18, %v335_v10  ;;  %v401_v21 = vadd.f32 %v400_v19, %v348_v8 }
 0x1bf   : > { %v476_v22 = vadd.f32 %v458_v17, %v388_v20 }
 0x1c0   : > { %v447_v23 = vpop.f32.mrf.mxu2 }
 0x1c3   : > { %v460_v24 = vpop.f32.mrf.mxu3 }
 0x1c4   : > { %v389_v25 = vpop.f32.mrf.mxu0  ;;  %v402_v26 = vpop.f32.mrf.mxu1 }
 0x1c8   : > { %v532_v27 = vpop.f32.mrf.mxu2 }
 0x1c9   : > { %v550_v57 = vadd.f32 %v532_v27, %v476_v22 }
 0x1cb   : > { %v545_v28 = vpop.f32.mrf.mxu3 }
 0x1cc   : > { %v471_v29 = vpop.f32.mrf.mxu0  ;;  %v519_v30 = vpop.f32.mrf.mxu1 }
 0x1cd   : > { %v477_v53 = vadd.f32 %v471_v29, %v401_v21  ;;  %v549_v58 = vadd.f32 %v519_v30, %v475_v16 }
 0x1cf   : > { %v551_v56 = vadd.f32 %v545_v28, %v477_v53 }
 0x1d0   : > { %v534_v31 = vpop.f32.mrf.mxu2 }
 0x1d3   : > { %v547_v32 = vpop.f32.mrf.mxu3 }
 0x1d4   : > { %v473_v33 = vpop.f32.mrf.mxu0  ;;  %v521_v34 = vpop.f32.mrf.mxu1 }
 0x1d8   : > { %v619_v35 = vpop.f32.mrf.mxu2 }
 0x1d9   : > { %v625_v59 = vadd.f32 %v619_v35, %v551_v56 }
 0x1db   : > { %v667_v36 = vpop.f32.mrf.mxu3 }
 0x1dc   : > { %v593_v37 = vpop.f32.mrf.mxu0  ;;  %v606_v38 = vpop.f32.mrf.mxu1 }
 0x1dd   : > { %v623_v60 = vadd.f32 %v593_v37, %v549_v58  ;;  %v624_v61 = vadd.f32 %v606_v38, %v550_v57 }
 0x1df   : > { %v697_v5 = vadd.f32 %v667_v36, %v623_v60 }
 0x1e0   : > { %v621_v39 = vpop.f32.mrf.mxu2 }
 0x1e3   : > { %v669_v40 = vpop.f32.mrf.mxu3 }
 0x1e4   : > { %v595_v41 = vpop.f32.mrf.mxu0  ;;  %v608_v42 = vpop.f32.mrf.mxu1 }
 0x1e8   : > { %v741_v43 = vpop.f32.mrf.mxu2 }
 0x1e9   : > { %v771_v6 = vadd.f32 %v741_v43, %v697_v5 }
 0x1eb   : > { %v754_v44 = vpop.f32.mrf.mxu3 }
 0x1ec   : > { %v680_v45 = vpop.f32.mrf.mxu0  ;;  %v693_v46 = vpop.f32.mrf.mxu1 }
 0x1ed   : > { %v699_v0 = vadd.f32 %v693_v46, %v625_v59  ;;  %v698_v3 = vadd.f32 %v680_v45, %v624_v61 }
 0x1ef   : > { %v772_v7 = vadd.f32 %v754_v44, %v698_v3 }
 0x1f0   : > { %v743_v47 = vpop.f32.mrf.mxu2 }
 0x1f3   : > { %v756_v48 = vpop.f32.mrf.mxu3 }
 0x1f4   : > { %v682_v49 = vpop.f32.mrf.mxu0  ;;  %v695_v50 = vpop.f32.mrf.mxu1 }
 0x1f8   : > { %v828_v51 = vpop.f32.mrf.mxu2 }
 0x1f9   : > { %v846_v9 = vadd.f32 %v828_v51, %v772_v7 }
 0x1fb   : > { %v841_v52 = vpop.f32.mrf.mxu3 }
 0x1fc   : > { %v767_v54 = vpop.f32.mrf.mxu0  ;;  %v815_v55 = vpop.f32.mrf.mxu1 }
 0x1fd   : > { %v773_v4 = vadd.f32 %v767_v54, %v699_v0  ;;  %v845_v10 = vadd.f32 %v815_v55, %v771_v6 }
 0x1ff   : > { %v847_v8 = vadd.f32 %v841_v52, %v773_v4 }
 0x200   : > { %v830_v62 = vpop.f32.mrf.mxu2 }
 0x203   : > { %v843_v63 = vpop.f32.mrf.mxu3 }
 0x204   : > { %v769_v1 = vpop.f32.mrf.mxu0  ;;  %v817_v2 = vpop.f32.mrf.mxu1 }
 0x208   : > { %v915_v11 = vpop.f32.mrf.mxu2 }
 0x209   : > { %v921_v13 = vadd.f32 %v915_v11, %v847_v8 }
 0x20b   : > { %v930_v18 = vmul.f32 %v926_v12, %v921_v13 }
 0x20c   : > { %v889_v14 = vpop.f32.mrf.mxu0  ;;  %v902_v15 = vpop.f32.mrf.mxu1 }
 0x20d   : > { %v919_v16 = vadd.f32 %v889_v14, %v845_v10  ;;  %v920_v17 = vadd.f32 %v902_v15, %v846_v9  ;;  %934 = vst.msk [vmem:[%s216_s19 + $0x10] sm:$0xff] %vm933_vm0, %v930_v18 }
 0x20f   : > { %v928_v19 = vmul.f32 %v926_v12, %v919_v16  ;;  %v929_v20 = vmul.f32 %v926_v12, %v920_v17 }
 0x210   : > { %v917_v21 = vpop.f32.mrf.mxu2 }
 0x211   : > { %931 = vst [vmem:[%s216_s19] sm:$0xff] %v928_v19 }
 0x212   : > { %932 = vst [vmem:[%s216_s19 + $0x8] sm:$0xff] %v929_v20 }
 0x213   : > { %1161 = shalt.err (!%p1158_p3)
}
 0x214   : > { %1083 = dma.vmem_to_hbm [thread:$0]  (%p1271_p5), %s950_s13, 384, %s952_s14, %s936_s20   ;;  %v891_v22 = vpop.f32.mrf.mxu0  ;;  %v904_v23 = vpop.f32.mrf.mxu1 }
 0x215 PF: > { %p1089_p4 = scmp.ge.s32.totalorder %s1196_s18, 2  ;;  %s963_s6 = sand.u32 1, %s1184_s15  }
 0x216   : > { %s964_s7 = scalar_lea.sflag [#allocation4], %s963_s6 }
 0x217   : > { %p1086_p7 = pnand %p1089_p4, %p1275_p6 }
 0x219   : > { %p1087_p8 = pneg %p1086_p7 }
 0x21b   : > { %1179 = dma.done.wait (%p1087_p8), %s964_s7, 384  }
 0x21c   : > { %1181 = vsyncadd (%p1087_p8), %s964_s7, 4294966912  ;;  %p14_p5 = scmp.ge.s32.totalorder %s1258_s21, 4   ;;  %s1433_s15 = smov %s1188_s16 }
 0x21d   : > { %s1434_s16 = smov %s1192_s17  ;;  %s1435_s17 = smov %s1269_s24 }
 0x21e   : > { %s1436_s18 = smov %s1258_s21  ;;  %16 = sbr.rel (!%p14_p5) target bundleno = 3 (0x3), region = 86 }
 0x223   :  { %970 = vsyncpa [#allocation4], 1 }
 0x224   :  { %972 = vsyncpa [#allocation4 + $0x1], 1 }

</bundles_post_ra>
